<compile_context>
chip_gen: v6e
topology: v6e:2x2x1
jax: 0.10.0
libtpu: 0.0.40
codegen_flags: <defaults>
</compile_context>

<pallas_src>
import functools

import jax
import jax.numpy as jnp
from jax.experimental import pallas as pl
from jax.experimental.pallas import tpu as pltpu


def _round_up(x, m):
    return ((x + m - 1) // m) * m


def _default_bf16_act():
    """bf16 elementwise is native on v6e/v7x; v5e (no bf16 VALU) keeps f32."""
    try:
        kind = jax.devices()[0].device_kind.lower()
        return ("v6" in kind) or ("v7" in kind)
    except Exception:  # pragma: no cover - conservative fallback
        return True


def _make_kernel(p_in_tail, p_out, bf16_act):
    """Build the fused-MLP kernel.

    p_in_tail: padded input widths of layers 1..n-1 (row-stacked in one ref).
    p_out:     padded output widths of all layers.
    """
    n_tail = len(p_in_tail)

    def kernel(x_ref, w1_ref, wpack_ref, bias_ref, out_ref):
        # Layer 0: cast the unpadded f32 state tile to bf16 in-kernel (no
        # wrapper-side pad/cast, no zero-padded feature stream from HBM).
        x = x_ref[...].astype(jnp.bfloat16)                       # (tm, S)
        acc = jnp.dot(x, w1_ref[...], preferred_element_type=jnp.float32)
        h = jnp.maximum(acc + bias_ref[0:1, 0:p_out[0]], 0.0)
        if bf16_act:
            h = h.astype(jnp.bfloat16)

        off = 0
        for layer in range(n_tail):
            rows = p_in_tail[layer]
            w = wpack_ref[off:off + rows, :]                      # static slice
            off += rows
            acc = jnp.dot(h.astype(jnp.bfloat16), w,
                          preferred_element_type=jnp.float32)
            acc = acc + bias_ref[layer + 1:layer + 2, 0:p_out[layer + 1]]
            if layer < n_tail - 1:
                h = jnp.maximum(acc, 0.0)
                if bf16_act:
                    h = h.astype(jnp.bfloat16)
            else:
                # Lane-dense (tm, 128) bf16 store: half the HBM writeback of
                # the previous f32 store; f32 accumulation preserved upstream.
                out_ref[...] = acc.astype(out_ref.dtype)

    return kernel


@functools.partial(jax.jit, static_argnames=("layer_dims", "bf16_act"))
def _qnetwork_forward_impl(state, w1_packed, w_tail_packed, bias_packed, *,
                           layer_dims, bf16_act):
    dims = layer_dims
    state_size = dims[0]
    action_size = dims[-1]
    p_out = tuple(_round_up(d, 128) for d in dims[1:])
    p_in_tail = tuple(_round_up(d, 128) for d in dims[1:-1])
    tail_cols = p_out[1]
    assert all(po == tail_cols for po in p_out[1:]), \
        "packed tail layers must share one padded width"
    assert state.shape[1] == state_size
    assert w1_packed.shape == (state_size, p_out[0])
    assert w_tail_packed.shape == (sum(p_in_tail), tail_cols)
    assert bias_packed.shape[1] == max(p_out)

    b = state.shape[0]

    # Batch tiling: even split, >= 2 grid steps when B >= 32 (v7x megacore),
    # tm a multiple of 16 (bf16 sublane tile).  TM_MAX=1024 amortizes the
    # ~0.35us/step grid overhead; total VMEM stays well under every chip's
    # default scoped limit (weights ~170 KiB resident, tiles < 1 MiB).
    TM_MAX = 1024
    grid_n = max(1, pl.cdiv(b, TM_MAX))
    if b >= 32:
        grid_n = max(grid_n, 2)
    tm = _round_up(max(pl.cdiv(b, grid_n), 8), 16)
    b_pad = tm * grid_n

    x = state
    if b_pad != b:
        # Batch-dim padding only; feature dim stays unpadded, dtype stays f32.
        x = jnp.pad(x, ((0, b_pad - b), (0, 0)))

    kernel = _make_kernel(p_in_tail, p_out, bf16_act)

    out = pl.pallas_call(
        kernel,
        out_shape=jax.ShapeDtypeStruct((b_pad, p_out[-1]), jnp.bfloat16),
        grid=(grid_n,),
        in_specs=[
            # (tm, state_size) is legal: last dim equals the full array dim.
            pl.BlockSpec((tm, state_size), lambda i: (i, 0)),
            pl.BlockSpec(w1_packed.shape, lambda i: (0, 0)),       # resident
            pl.BlockSpec(w_tail_packed.shape, lambda i: (0, 0)),   # resident
            pl.BlockSpec(bias_packed.shape, lambda i: (0, 0)),     # resident
        ],
        out_specs=pl.BlockSpec((tm, p_out[-1]), lambda i: (i, 0)),
        compiler_params=pltpu.CompilerParams(
            dimension_semantics=("parallel",)),                    # v7x 2-TC
    )(x, w1_packed, w_tail_packed, bias_packed)

    # Slice padded rows/cols; return f32 Q-values like the PyTorch module.
    return out[:b, :action_size].astype(jnp.float32)


def qnetwork_forward(state, w1_packed, w_tail_packed, bias_packed, *,
                     layer_dims, bf16_act=None):
    if bf16_act is None:
        bf16_act = _default_bf16_act()
    return _qnetwork_forward_impl(state, w1_packed, w_tail_packed, bias_packed,
                                  layer_dims=layer_dims, bf16_act=bool(bf16_act))


def init_qnetwork_params(key, state_size, action_size,
                         hidden_size=(256, 128, 64, 64)):
    """Deterministic synthetic init matching the PyTorch module's shapes.

    Weights ~ N(0, 0.1) as in the module; biases use the PyTorch Linear
    default U(-1/sqrt(fan_in), 1/sqrt(fan_in)).  Weights are stored
    pre-transposed as (in, out), biases as (1, out), all float32.
    """
    dims = [state_size] + list(hidden_size) + [action_size]
    params = []
    for i in range(len(dims) - 1):
        fan_in, fan_out = dims[i], dims[i + 1]
        key, kw, kb = jax.random.split(key, 3)
        w = 0.1 * jax.random.normal(kw, (fan_in, fan_out), dtype=jnp.float32)
        bound = 1.0 / (fan_in ** 0.5)
        b = jax.random.uniform(kb, (1, fan_out), dtype=jnp.float32,
                               minval=-bound, maxval=bound)
        params.extend([w, b])
    return tuple(params)


def pack_qnetwork_params(params):
    """Pack f32 (in,out)/(1,out) params for the kernel.

    Returns:
      w1_packed:     (state_size, pad(h1)) bf16  -- NO row padding
      w_tail_packed: (sum(pad(h1..h4)), pad128) bf16, w2|w3|w4|wo row-stacked
      bias_packed:   (8, max(pad(out))) f32, row i = bias of layer i (zero-pad)
    """
    ws = list(params[0::2])
    bs = list(params[1::2])
    p_out = [_round_up(w.shape[1], 128) for w in ws]

    w1 = ws[0]
    w1_packed = jnp.pad(
        w1, ((0, 0), (0, p_out[0] - w1.shape[1]))).astype(jnp.bfloat16)

    tail_cols = p_out[1]
    assert all(po == tail_cols for po in p_out[1:]), \
        "packed tail layers must share one padded width"
    tail = []
    for w in ws[1:]:
        pi = _round_up(w.shape[0], 128)
        tail.append(jnp.pad(
            w, ((0, pi - w.shape[0]), (0, tail_cols - w.shape[1]))
        ).astype(jnp.bfloat16))
    w_tail_packed = jnp.concatenate(tail, axis=0)

    bias_cols = max(p_out)
    rows = [
        jnp.pad(b.reshape(1, -1), ((0, 0), (0, bias_cols - b.shape[-1])))
        for b in bs
    ]
    bias_packed = jnp.concatenate(rows, axis=0).astype(jnp.float32)
    bias_packed = jnp.pad(bias_packed, ((0, 8 - bias_packed.shape[0]), (0, 0)))
    return w1_packed, w_tail_packed, bias_packed


def _reference_forward(state, params):
    """Plain-JAX reference matching the kernel numerics (bf16 matmul inputs,
    f32 accumulation, bf16 final store)."""
    ws = params[0::2]
    bs = params[1::2]
    h = state.astype(jnp.bfloat16)
    acc = None
    for i, (w, b) in enumerate(zip(ws, bs)):
        acc = jnp.dot(h, w.astype(jnp.bfloat16),
                      preferred_element_type=jnp.float32) + b
        if i < len(ws) - 1:
            h = jnp.maximum(acc, 0.0).astype(jnp.bfloat16)
    return acc.astype(jnp.bfloat16).astype(jnp.float32)


if __name__ == "__main__":
    BATCH = 8
    STATE_SIZE = 16
    ACTION_SIZE = 4
    HIDDEN = (256, 128, 64, 64)

    key = jax.random.PRNGKey(0)
    key, k_state = jax.random.split(key)
    state = jax.random.normal(k_state, (BATCH, STATE_SIZE), dtype=jnp.float32)

    params = init_qnetwork_params(key, STATE_SIZE, ACTION_SIZE, HIDDEN)
    w1_packed, w_tail_packed, bias_packed = pack_qnetwork_params(params)

    layer_dims = (STATE_SIZE,) + HIDDEN + (ACTION_SIZE,)
    q_vals = qnetwork_forward(state, w1_packed, w_tail_packed, bias_packed,
                              layer_dims=layer_dims)
    q_vals = jax.block_until_ready(q_vals)

    ref = _reference_forward(state, params)
    assert q_vals.shape == (BATCH, ACTION_SIZE)
    assert jnp.allclose(q_vals, ref, atol=2e-2, rtol=2e-2), \
        f"max abs diff {jnp.max(jnp.abs(q_vals - ref))}"

    print("KERNEL_OK")
</pallas_src>

<mosaic_0001>
module attributes {stable_mosaic.version = 11 : i64} {
  func.func @kernel(%arg0: i32, %arg1: memref<16x16xf32, #tpu.memory_space<vmem>>, %arg2: memref<16x256xbf16, #tpu.memory_space<vmem>>, %arg3: memref<640x128xbf16, #tpu.memory_space<vmem>>, %arg4: memref<8x256xf32, #tpu.memory_space<vmem>>, %arg5: memref<16x128xbf16, #tpu.memory_space<vmem>>) attributes {dimension_semantics = [#tpu.dimension_semantics<parallel>], iteration_bounds = array<i64: 1>, scalar_prefetch = 0 : i64, scratch_operands = 0 : i64, tpu.core_type = #tpu.core_type<tc>, window_params = [{transform_indices = @transform_0, window_bounds = array<i64: 16, 16>}, {pipeline_mode = #tpu.pipeline_mode<synchronous>, transform_indices = @transform_1, window_bounds = array<i64: 16, 256>}, {pipeline_mode = #tpu.pipeline_mode<synchronous>, transform_indices = @transform_2, window_bounds = array<i64: 640, 128>}, {pipeline_mode = #tpu.pipeline_mode<synchronous>, transform_indices = @transform_3, window_bounds = array<i64: 8, 256>}, {transform_indices = @transform_4, window_bounds = array<i64: 16, 128>}]} {
    %c0 = arith.constant 0 : index
    %c0_0 = arith.constant 0 : index
    %0 = vector.load %arg1[%c0, %c0_0] : memref<16x16xf32, #tpu.memory_space<vmem>>, vector<16x16xf32>
    %1 = arith.truncf %0 : vector<16x16xf32> to vector<16x16xbf16>
    %c0_1 = arith.constant 0 : index
    %c0_2 = arith.constant 0 : index
    %2 = vector.load %arg2[%c0_1, %c0_2] : memref<16x256xbf16, #tpu.memory_space<vmem>>, vector<16x256xbf16>
    %cst = arith.constant dense<0.000000e+00> : vector<16x256xf32>
    %3 = tpu.matmul %1, %2, %cst {dimension_numbers = #tpu.dot_dimension_numbers<[1], [0], [0], [1], [0, 0, 1, 1], [], []>} : vector<16x16xbf16>, vector<16x256xbf16>, vector<16x256xf32> -> vector<16x256xf32>
    %c0_3 = arith.constant 0 : index
    %c0_4 = arith.constant 0 : index
    %4 = vector.load %arg4[%c0_3, %c0_4] : memref<8x256xf32, #tpu.memory_space<vmem>>, vector<1x256xf32>
    %5 = vector.broadcast %4 : vector<1x256xf32> to vector<16x256xf32>
    %6 = arith.addf %3, %5 : vector<16x256xf32>
    %cst_5 = arith.constant 0.000000e+00 : f32
    %7 = vector.broadcast %cst_5 : f32 to vector<16x256xf32>
    %8 = arith.maximumf %6, %7 : vector<16x256xf32>
    %c0_6 = arith.constant 0 : index
    %c0_7 = arith.constant 0 : index
    %9 = vector.load %arg3[%c0_6, %c0_7] : memref<640x128xbf16, #tpu.memory_space<vmem>>, vector<256x128xbf16>
    %10 = arith.truncf %8 : vector<16x256xf32> to vector<16x256xbf16>
    %cst_8 = arith.constant dense<0.000000e+00> : vector<16x128xf32>
    %11 = tpu.matmul %10, %9, %cst_8 {dimension_numbers = #tpu.dot_dimension_numbers<[1], [0], [0], [1], [0, 0, 1, 1], [], []>} : vector<16x256xbf16>, vector<256x128xbf16>, vector<16x128xf32> -> vector<16x128xf32>
    %c1 = arith.constant 1 : index
    %c0_9 = arith.constant 0 : index
    %12 = vector.load %arg4[%c1, %c0_9] : memref<8x256xf32, #tpu.memory_space<vmem>>, vector<1x128xf32>
    %13 = vector.broadcast %12 : vector<1x128xf32> to vector<16x128xf32>
    %14 = arith.addf %11, %13 : vector<16x128xf32>
    %cst_10 = arith.constant 0.000000e+00 : f32
    %15 = vector.broadcast %cst_10 : f32 to vector<16x128xf32>
    %16 = arith.maximumf %14, %15 : vector<16x128xf32>
    %c256 = arith.constant 256 : index
    %c0_11 = arith.constant 0 : index
    %17 = vector.load %arg3[%c256, %c0_11] : memref<640x128xbf16, #tpu.memory_space<vmem>>, vector<128x128xbf16>
    %18 = arith.truncf %16 : vector<16x128xf32> to vector<16x128xbf16>
    %cst_12 = arith.constant dense<0.000000e+00> : vector<16x128xf32>
    %19 = tpu.matmul %18, %17, %cst_12 {dimension_numbers = #tpu.dot_dimension_numbers<[1], [0], [0], [1], [0, 0, 1, 1], [], []>} : vector<16x128xbf16>, vector<128x128xbf16>, vector<16x128xf32> -> vector<16x128xf32>
    %c2 = arith.constant 2 : index
    %c0_13 = arith.constant 0 : index
    %20 = vector.load %arg4[%c2, %c0_13] : memref<8x256xf32, #tpu.memory_space<vmem>>, vector<1x128xf32>
    %21 = vector.broadcast %20 : vector<1x128xf32> to vector<16x128xf32>
    %22 = arith.addf %19, %21 : vector<16x128xf32>
    %cst_14 = arith.constant 0.000000e+00 : f32
    %23 = vector.broadcast %cst_14 : f32 to vector<16x128xf32>
    %24 = arith.maximumf %22, %23 : vector<16x128xf32>
    %c384 = arith.constant 384 : index
    %c0_15 = arith.constant 0 : index
    %25 = vector.load %arg3[%c384, %c0_15] : memref<640x128xbf16, #tpu.memory_space<vmem>>, vector<128x128xbf16>
    %26 = arith.truncf %24 : vector<16x128xf32> to vector<16x128xbf16>
    %cst_16 = arith.constant dense<0.000000e+00> : vector<16x128xf32>
    %27 = tpu.matmul %26, %25, %cst_16 {dimension_numbers = #tpu.dot_dimension_numbers<[1], [0], [0], [1], [0, 0, 1, 1], [], []>} : vector<16x128xbf16>, vector<128x128xbf16>, vector<16x128xf32> -> vector<16x128xf32>
    %c3 = arith.constant 3 : index
    %c0_17 = arith.constant 0 : index
    %28 = vector.load %arg4[%c3, %c0_17] : memref<8x256xf32, #tpu.memory_space<vmem>>, vector<1x128xf32>
    %29 = vector.broadcast %28 : vector<1x128xf32> to vector<16x128xf32>
    %30 = arith.addf %27, %29 : vector<16x128xf32>
    %cst_18 = arith.constant 0.000000e+00 : f32
    %31 = vector.broadcast %cst_18 : f32 to vector<16x128xf32>
    %32 = arith.maximumf %30, %31 : vector<16x128xf32>
    %c512 = arith.constant 512 : index
    %c0_19 = arith.constant 0 : index
    %33 = vector.load %arg3[%c512, %c0_19] : memref<640x128xbf16, #tpu.memory_space<vmem>>, vector<128x128xbf16>
    %34 = arith.truncf %32 : vector<16x128xf32> to vector<16x128xbf16>
    %cst_20 = arith.constant dense<0.000000e+00> : vector<16x128xf32>
    %35 = tpu.matmul %34, %33, %cst_20 {dimension_numbers = #tpu.dot_dimension_numbers<[1], [0], [0], [1], [0, 0, 1, 1], [], []>} : vector<16x128xbf16>, vector<128x128xbf16>, vector<16x128xf32> -> vector<16x128xf32>
    %c4 = arith.constant 4 : index
    %c0_21 = arith.constant 0 : index
    %36 = vector.load %arg4[%c4, %c0_21] : memref<8x256xf32, #tpu.memory_space<vmem>>, vector<1x128xf32>
    %37 = vector.broadcast %36 : vector<1x128xf32> to vector<16x128xf32>
    %38 = arith.addf %35, %37 : vector<16x128xf32>
    %39 = arith.truncf %38 : vector<16x128xf32> to vector<16x128xbf16>
    %c0_22 = arith.constant 0 : index
    %c0_23 = arith.constant 0 : index
    %40 = vector.load %arg5[%c0_22, %c0_23] : memref<16x128xbf16, #tpu.memory_space<vmem>>, vector<16x128xbf16>
    tpu.vector_store %arg5[%c0_22, %c0_23], %39 {strides = array<i32>} : memref<16x128xbf16, #tpu.memory_space<vmem>>, vector<16x128xbf16>,
    return
  }
  func.func @transform_0(%arg0: i32) -> (i32, i32) {
    %c0_i32 = arith.constant 0 : i32
    %c0_i32_0 = arith.constant 0 : i32
    return %arg0, %c0_i32 : i32, i32
  }
  func.func @transform_1(%arg0: i32) -> (i32, i32) {
    %c0_i32 = arith.constant 0 : i32
    %c0_i32_0 = arith.constant 0 : i32
    %c0_i32_1 = arith.constant 0 : i32
    return %c0_i32, %c0_i32_0 : i32, i32
  }
  func.func @transform_2(%arg0: i32) -> (i32, i32) {
    %c0_i32 = arith.constant 0 : i32
    %c0_i32_0 = arith.constant 0 : i32
    %c0_i32_1 = arith.constant 0 : i32
    return %c0_i32, %c0_i32_0 : i32, i32
  }
  func.func @transform_3(%arg0: i32) -> (i32, i32) {
    %c0_i32 = arith.constant 0 : i32
    %c0_i32_0 = arith.constant 0 : i32
    %c0_i32_1 = arith.constant 0 : i32
    return %c0_i32, %c0_i32_0 : i32, i32
  }
  func.func @transform_4(%arg0: i32) -> (i32, i32) {
    %c0_i32 = arith.constant 0 : i32
    %c0_i32_0 = arith.constant 0 : i32
    return %arg0, %c0_i32 : i32, i32
  }
}

</mosaic_0001>

<bundles_post_ra>
// kernel: _qnetwork_forward_impl.1
= control target key start
LH: loop header
LB: loop body
LE: loop exit
PB: predicated region body
PF: predicated region fallthrough
CT: control target
= control target key end

     0   :  { %9 = vsyncpa [#allocation3], 0  ;;  %s975_s0 = inlined_call_operand.vmem [shape: f32[16,16], index: 0, kind: input, shape index: {}]   ;;  %s976_s1 = inlined_call_operand.vmem [shape: bf16[16,256], index: 1, kind: input, shape index: {}]   ;;  %s977_s2 = inlined_call_operand.hbm [shape: bf16[640,128], index: 2, kind: input, shape index: {}]   ;;  %s978_s3 = inlined_call_operand.hbm [shape: f32[8,256], index: 3, kind: input, shape index: {}]   ;;  %s979_s4 = inlined_call_operand.vmem [shape: bf16[16,128], index: 4, kind: output, shape index: {}]  }
   0x1   :  { %10 = vsyncpa [#allocation5], 0  ;;  %s892_s15 = smov [#allocation2]  }
   0x2   :  { %s20_s16 = sshll.u32 %s892_s15, 4  ;;  %s21_s16 = int_to_ptr.vmem [resolvable:$true] %s20_s16 }
   0x3   :  { %s856_s17 = scalar_lea.vmem %s21_s16, 5120  ;;  %p861_p1 = scmp.lt.s32.totalorder %s21_s16, %s21_s16 }
   0x4   :  { %p857_p0 = scmp.ne.s32.totalorder %s21_s16, %s856_s17  ;;  %p862_p2 = scmp.lt.s32.totalorder %s856_s17, %s856_s17 }
   0x6   :  { %p863_p3 = por %p862_p2, %p861_p1 }
   0x8   :  { %p864_p4 = pnand %p863_p3, %p857_p0 }
   0xa   :  { %867 = shalt.err (!%p864_p4)
}
   0xb   :  { %s893_s18 = smov 64   ;;  %s894_s19 = smov 4  }
   0xc   :  { %26 = dma.hbm_to_vmem [thread:$0]  %s977_s2, 5120, %s21_s16, [#allocation3], %s893_s18, %s893_s18, %s894_s19  }
   0xd   :  { %s895_s22 = smov [#allocation4]  }
   0xe   :  { %s33_s23 = sshll.u32 %s895_s22, 4  ;;  %s34_s23 = int_to_ptr.vmem [resolvable:$true] %s33_s23 }
   0xf   :  { %s876_s24 = scalar_lea.vmem %s34_s23, 256  ;;  %p881_p6 = scmp.lt.s32.totalorder %s34_s23, %s34_s23 }
  0x10   :  { %p877_p5 = scmp.ne.s32.totalorder %s34_s23, %s876_s24  ;;  %p882_p7 = scmp.lt.s32.totalorder %s876_s24, %s876_s24 }
  0x12   :  { %p883_p8 = por %p882_p7, %p881_p6 }
  0x14   :  { %p884_p9 = pnand %p883_p8, %p877_p5 }
  0x16   :  { %887 = shalt.err (!%p884_p9)
}
  0x17   :  { %36 = dma.hbm_to_vmem [thread:$0]  %s978_s3, 256, %s34_s23, [#allocation5]  }
  0x18   :  { %888 = dma.done.wait [#allocation3], 5120  }
  0x19   :  { %889 = vsyncadd [#allocation3], 4294962176 }
  0x1a   :  { %890 = dma.done.wait [#allocation5], 256  }
  0x1b   :  { %891 = vsyncadd [#allocation5], 4294967040  ;;  %v896_v0 = vmov 0   ;;  %v805_v1 = vld [vmem:[%s976_s1 + $0x4] ss:$8 sps:$4 sm:$0xff]   ;;  %v808_v6 = vld [vmem:[#allocation2 + $0x78] sm:$0xff]   ;;  %v51_v27 = vlaneseq }
  0x1c   :  { %107 = vmatprep.mubr.bf16.mxu0 %v896_v0  ;;  %v807_v2 = vld [vmem:[%s976_s1] ss:$8 sps:$4 sm:$0xff]   ;;  %89 = vmatprep.subr.bf16.mxu0 %v805_v1  ;;  %vm71_vm0 = vcmask 130048   ;;  %v809_v7 = vld [vmem:[#allocation2 + $0x38] sm:$0xff]   ;;  %v810_v8 = vld [vmem:[#allocation2 + $0x70] sm:$0xff]   ;;  %v897_v23 = vmov 0.0  }
  0x1d   :  { %v44_v3 = vld [vmem:[%s975_s0] sm:$0xff]  ;;  %v45_v4 = vld [vmem:[%s975_s0 + $0x8] sm:$0xff]  ;;  %90 = vmatpush1.bf16.msra.mxu0 %v807_v2  ;;  %689 = vmatprep.subr.bf16.mxu1 %v808_v6  ;;  %v811_v9 = vld [vmem:[#allocation2 + $0x30] sm:$0xff]   ;;  %v52_v28 = vshrl.u32 %v51_v27, 7  ;;  %vm898_vm1 = vmmov 0  }
  0x1e   :  { %v46_v5 = vpack.c.bf16 %v45_v4, %v44_v3  ;;  %690 = vmatpush3.bf16.msra.mxu1 %v809_v7  ;;  %v812_v10 = vld [vmem:[#allocation2 + $0x68] sm:$0xff]   ;;  %v814_v12 = vld [vmem:[#allocation2 + $0x60] sm:$0xff]   ;;  %v816_v14 = vld [vmem:[#allocation2 + $0x58] sm:$0xff]   ;;  %738 = vmatprep.subr.bf16.mxu0 %v897_v23 }
  0x1f   :  { %691 = vmatprep.subr.bf16.mxu1 %v810_v8  ;;  %v813_v11 = vld [vmem:[#allocation2 + $0x28] sm:$0xff]   ;;  %v815_v13 = vld [vmem:[#allocation2 + $0x20] sm:$0xff]   ;;  %v817_v15 = vld [vmem:[#allocation2 + $0x18] sm:$0xff]   ;;  %v57_v29 = vsub.s32 1, %v52_v28  ;;  %v53_v30 = vsub.s32 0, %v52_v28 }
  0x20   :  { %639 = vmatmul.mubr.msk.bf16.vlgmr.msra.gmra.mxu0 %vm71_vm0, %v46_v5  ;;  %v818_v16 = vld [vmem:[#allocation2 + $0x50] sm:$0xff]   ;;  %v820_v18 = vld [vmem:[#allocation2 + $0x48] sm:$0xff]   ;;  %v822_v20 = vld [vmem:[#allocation2 + $0x40] sm:$0xff]  }
  0x21   :  { %v819_v17 = vld [vmem:[#allocation2 + $0x10] sm:$0xff]   ;;  %v821_v19 = vld [vmem:[#allocation2 + $0x8] sm:$0xff]   ;;  %v823_v21 = vld [vmem:[#allocation2] sm:$0xff]   ;;  %754 = vmatprep.mubr.msk.bf16.mxu0 %vm898_vm1, %v897_v23 }
  0x22   :  { %692 = vmatpush3.bf16.msra.mxu1 %v811_v9  ;;  %v824_v22 = vld [vmem:[#allocation2 + $0xb8] sm:$0xff]   ;;  %v825_v24 = vld [vmem:[#allocation2 + $0xb0] sm:$0xff]   ;;  %v826_v25 = vld [vmem:[#allocation2 + $0xa8] sm:$0xff]  }
  0x23   :  { %693 = vmatprep.subr.bf16.mxu1 %v812_v10  ;;  %739 = vmatpush3.bf16.msra.mxu0 %v824_v22  ;;  %v827_v26 = vld [vmem:[#allocation2 + $0xa0] sm:$0xff]   ;;  %v828_v48 = vld [vmem:[#allocation2 + $0x98] sm:$0xff]   ;;  %v829_v49 = vld [vmem:[#allocation2 + $0x90] sm:$0xff]  }
  0x24   :  { %740 = vmatprep.subr.bf16.mxu0 %v897_v23  ;;  %v49_v31 = vld [vmem:[#allocation4] ss:$8 sm:$0x3]  ;;  %v832_v52 = vld [vmem:[#allocation2 + $0xf8] sm:$0xff]   ;;  %v833_v53 = vld [vmem:[#allocation2 + $0xf0] sm:$0xff]  }
  0x25   :  { %v58_v33 = vrot.slane %v49_v31, %v57_v29  ;;  %v54_v34 = vrot.slane %v49_v31, %v53_v30  ;;  %v830_v50 = vld [vmem:[#allocation2 + $0x88] sm:$0xff]   ;;  %v831_v51 = vld [vmem:[#allocation2 + $0x80] sm:$0xff]   ;;  %v836_v56 = vld [vmem:[#allocation2 + $0xd8] sm:$0xff]  }
  0x26   :  { %694 = vmatpush3.bf16.msra.mxu1 %v813_v11  ;;  %v834_v54 = vld [vmem:[#allocation2 + $0xe8] sm:$0xff]   ;;  %v835_v55 = vld [vmem:[#allocation2 + $0xe0] sm:$0xff]   ;;  %v837_v5 = vld [vmem:[#allocation2 + $0xd0] sm:$0xff]  }
  0x27   :  { %695 = vmatprep.subr.bf16.mxu1 %v814_v12  ;;  %741 = vmatpush3.bf16.msra.mxu0 %v825_v24  ;;  %v156_v60 = vld [vmem:[#allocation4 + $0x1] ss:$0 sm:$0xff]  ;;  %v838_v6 = vld [vmem:[#allocation2 + $0xc8] sm:$0xff]   ;;  %v840_v8 = vld [vmem:[#allocation2 + $0x138] sm:$0xff]  }
  0x28   :  { %742 = vmatprep.subr.bf16.mxu0 %v897_v23  ;;  %v839_v7 = vld [vmem:[#allocation2 + $0xc0] sm:$0xff]   ;;  %v841_v9 = vld [vmem:[#allocation2 + $0x130] sm:$0xff]   ;;  %v842_v10 = vld [vmem:[#allocation2 + $0x128] sm:$0xff]  }
  0x29   :  { %v843_v11 = vld [vmem:[#allocation2 + $0x120] sm:$0xff]   ;;  %v844_v12 = vld [vmem:[#allocation2 + $0x118] sm:$0xff]   ;;  %v845_v24 = vld [vmem:[#allocation2 + $0x110] sm:$0xff]  }
  0x2a   :  { %696 = vmatpush3.bf16.msra.mxu1 %v815_v13  ;;  %v313_v13 = vld [vmem:[#allocation4 + $0x2] ss:$0 sm:$0xff]  ;;  %v422_v27 = vld [vmem:[#allocation4 + $0x3] ss:$0 sm:$0xff] }
  0x2b   :  { %697 = vmatprep.subr.bf16.mxu1 %v816_v14  ;;  %743 = vmatpush3.bf16.msra.mxu0 %v826_v25  ;;  %v846_v25 = vld [vmem:[#allocation2 + $0x108] sm:$0xff]  }
  0x2c   :  { %744 = vmatprep.subr.bf16.mxu0 %v897_v23 }
  0x2e   :  { %698 = vmatpush3.bf16.msra.mxu1 %v817_v15 }
  0x2f   :  { %699 = vmatprep.subr.bf16.mxu1 %v818_v16  ;;  %745 = vmatpush3.bf16.msra.mxu0 %v827_v26  ;;  %v847_v26 = vld [vmem:[#allocation2 + $0x100] sm:$0xff]  }
  0x30   :  { %746 = vmatprep.subr.bf16.mxu0 %v897_v23 }
  0x32   :  { %700 = vmatpush3.bf16.msra.mxu1 %v819_v17 }
  0x33   :  { %701 = vmatprep.subr.bf16.mxu1 %v820_v18  ;;  %747 = vmatpush3.bf16.msra.mxu0 %v828_v48 }
  0x34   :  { %748 = vmatprep.subr.bf16.mxu0 %v897_v23 }
  0x36   :  { %702 = vmatpush3.bf16.msra.mxu1 %v821_v19 }
  0x37   :  { %703 = vmatprep.subr.bf16.mxu1 %v822_v20  ;;  %749 = vmatpush3.bf16.msra.mxu0 %v829_v49 }
  0x38   :  { %750 = vmatprep.subr.bf16.mxu0 %v897_v23 }
  0x3a   :  { %704 = vmatpush3.bf16.msra.mxu1 %v823_v21 }
  0x3b   :  { %758 = vmatprep.subr.bf16.mxu1 %v897_v23  ;;  %751 = vmatpush3.bf16.msra.mxu0 %v830_v50 }
  0x3c   :  { %752 = vmatprep.subr.bf16.mxu0 %v897_v23 }
  0x3f   :  { %753 = vmatpush3.bf16.msra.mxu0 %v831_v51 }
  0x40   :  { %778 = vmatprep.subr.bf16.mxu0 %v897_v23 }
  0xe0   :  { %v109_v32 = vpop.f32.mrf.mxu0 }
  0xe1   :  { %v110_v39 = vadd.f32 %v109_v32, %v54_v34 }
  0xe2   :  { %v111_v35 = vpop.f32.mrf.mxu0 }
  0xe3   :  { %v112_v37 = vadd.f32 %v111_v35, %v58_v33  ;;  %v118_v45 = vmax.f32 %v110_v39, 0.0 }
  0xe4   :  { %v113_v36 = vpop.f32.mrf.mxu0 }
  0xe5   :  { %v114_v38 = vadd.f32 %v113_v36, %v54_v34  ;;  %v119_v43 = vmax.f32 %v112_v37, 0.0 }
  0xe6   :  { %v115_v40 = vpop.f32.mrf.mxu0 }
  0xe7   :  { %v116_v41 = vadd.f32 %v115_v40, %v58_v33  ;;  %v120_v42 = vmax.f32 %v114_v38, 0.0  ;;  %v531_v38 = vld [vmem:[#allocation4 + $0x4] ss:$0 sm:$0xff] }
  0xe9   :  { %v121_v44 = vmax.f32 %v116_v41, 0.0  ;;  %v154_v47 = vpack.c.bf16 %v120_v42, %v118_v45 }
  0xeb   :  { %v155_v46 = vpack.c.bf16 %v121_v44, %v119_v43 }
  0xed   :  { %285 = vmatprep.mubr.bf16.mxu1 %v155_v46 }
  0xee   :  { %286 = vmatmul.mubr.bf16.vlgmr.msra.gmra.mxu1 %v154_v47 }
  0xef   :  { %774 = vmatprep.mubr.msk.bf16.mxu1 %vm898_vm1, %v897_v23  ;;  %759 = vmatpush3.bf16.msra.mxu1 %v832_v52 }
  0xf0   :  { %760 = vmatprep.subr.bf16.mxu1 %v897_v23 }
  0xf3   :  { %761 = vmatpush3.bf16.msra.mxu1 %v833_v53 }
  0xf4   :  { %762 = vmatprep.subr.bf16.mxu1 %v897_v23 }
  0xf7   :  { %763 = vmatpush3.bf16.msra.mxu1 %v834_v54 }
  0xf8   :  { %764 = vmatprep.subr.bf16.mxu1 %v897_v23 }
  0xfb   :  { %765 = vmatpush3.bf16.msra.mxu1 %v835_v55 }
  0xfc   :  { %766 = vmatprep.subr.bf16.mxu1 %v897_v23 }
  0xff   :  { %767 = vmatpush3.bf16.msra.mxu1 %v836_v56 }
 0x100   :  { %768 = vmatprep.subr.bf16.mxu1 %v897_v23 }
 0x103   :  { %769 = vmatpush3.bf16.msra.mxu1 %v837_v5 }
 0x104   :  { %770 = vmatprep.subr.bf16.mxu1 %v897_v23 }
 0x107   :  { %771 = vmatpush3.bf16.msra.mxu1 %v838_v6 }
 0x108   :  { %772 = vmatprep.subr.bf16.mxu1 %v897_v23 }
 0x10b   :  { %773 = vmatpush3.bf16.msra.mxu1 %v839_v7 }
 0x1ae   :  { %v705_v57 = vpop.f32.mrf.mxu1 }
 0x1b0   :  { %v706_v58 = vpop.f32.mrf.mxu1 }
 0x1b1   :  { %v707_v59 = vadd.f32 %v706_v58, %v705_v57 }
 0x1b2   :  { %v708_v61 = vpop.f32.mrf.mxu1 }
 0x1b3   :  { %v288_v63 = vadd.f32 %v707_v59, %v156_v60 }
 0x1b4   :  { %v709_v62 = vpop.f32.mrf.mxu1 }
 0x1b5   :  { %v710_v0 = vadd.f32 %v709_v62, %v708_v61  ;;  %v294_v2 = vmax.f32 %v288_v63, 0.0 }
 0x1b7   :  { %v291_v1 = vadd.f32 %v710_v0, %v156_v60 }
 0x1b9   :  { %v295_v3 = vmax.f32 %v291_v1, 0.0 }
 0x1bb   :  { %v312_v4 = vpack.c.bf16 %v295_v3, %v294_v2 }
 0x1bd   :  { %755 = vmatmul.mubr.bf16.vlgmr.msra.gmra.mxu0 %v312_v4 }
 0x1be   :  { %794 = vmatprep.mubr.msk.bf16.mxu0 %vm898_vm1, %v897_v23  ;;  %779 = vmatpush3.bf16.msra.mxu0 %v840_v8 }
 0x1bf   :  { %780 = vmatprep.subr.bf16.mxu0 %v897_v23 }
 0x1c2   :  { %781 = vmatpush3.bf16.msra.mxu0 %v841_v9 }
 0x1c3   :  { %782 = vmatprep.subr.bf16.mxu0 %v897_v23 }
 0x1c6   :  { %783 = vmatpush3.bf16.msra.mxu0 %v842_v10 }
 0x1c7   :  { %784 = vmatprep.subr.bf16.mxu0 %v897_v23 }
 0x1ca   :  { %785 = vmatpush3.bf16.msra.mxu0 %v843_v11 }
 0x1cb   :  { %786 = vmatprep.subr.bf16.mxu0 %v897_v23 }
 0x1ce   :  { %787 = vmatpush3.bf16.msra.mxu0 %v844_v12 }
 0x1cf   :  { %788 = vmatprep.subr.bf16.mxu0 %v897_v23 }
 0x1d2   :  { %789 = vmatpush3.bf16.msra.mxu0 %v845_v24 }
 0x1d3   :  { %790 = vmatprep.subr.bf16.mxu0 %v897_v23 }
 0x1d6   :  { %791 = vmatpush3.bf16.msra.mxu0 %v846_v25 }
 0x1d7   :  { %792 = vmatprep.subr.bf16.mxu0 %v897_v23 }
 0x1da   :  { %793 = vmatpush3.bf16.msra.mxu0 %v847_v26 }
 0x27d   :  { %v396_v14 = vpop.f32.mrf.mxu0 }
 0x27e   :  { %v397_v16 = vadd.f32 %v396_v14, %v313_v13 }
 0x27f   :  { %v756_v15 = vpop.f32.mrf.mxu0 }
 0x280   :  { %v403_v20 = vmax.f32 %v397_v16, 0.0 }
 0x281   :  { %v399_v17 = vpop.f32.mrf.mxu0 }
 0x282   :  { %v400_v18 = vadd.f32 %v399_v17, %v313_v13 }
 0x283   :  { %v757_v19 = vpop.f32.mrf.mxu0 }
 0x284   :  { %v404_v21 = vmax.f32 %v400_v18, 0.0 }
 0x286   :  { %v421_v22 = vpack.c.bf16 %v404_v21, %v403_v20 }
 0x288   :  { %775 = vmatmul.mubr.bf16.vlgmr.msra.gmra.mxu1 %v421_v22 }
 0x348   :  { %v505_v28 = vpop.f32.mrf.mxu1 }
 0x349   :  { %v506_v30 = vadd.f32 %v505_v28, %v422_v27 }
 0x34a   :  { %v776_v29 = vpop.f32.mrf.mxu1 }
 0x34b   :  { %v512_v34 = vmax.f32 %v506_v30, 0.0 }
 0x34c   :  { %v508_v31 = vpop.f32.mrf.mxu1 }
 0x34d   :  { %v509_v32 = vadd.f32 %v508_v31, %v422_v27 }
 0x34e   :  { %v777_v33 = vpop.f32.mrf.mxu1 }
 0x34f   :  { %v513_v35 = vmax.f32 %v509_v32, 0.0 }
 0x351   :  { %v530_v36 = vpack.c.bf16 %v513_v35, %v512_v34 }
 0x353   :  { %795 = vmatmul.mubr.bf16.vlgmr.msra.gmra.mxu0 %v530_v36 }
 0x413   :  { %v614_v37 = vpop.f32.mrf.mxu0 }
 0x414   :  { %v615_v41 = vadd.f32 %v614_v37, %v531_v38 }
 0x415   :  { %v796_v39 = vpop.f32.mrf.mxu0 }
 0x417   :  { %v617_v40 = vpop.f32.mrf.mxu0 }
 0x418   :  { %v618_v42 = vadd.f32 %v617_v40, %v531_v38 }
 0x419   :  { %v797_v23 = vpop.f32.mrf.mxu0 }
 0x41a   :  { %v687_v43 = vpack.c.bf16 %v618_v42, %v615_v41 }
 0x41c   :  { %688 = vst [vmem:[%s979_s4] sm:$0xff] %v687_v43  }
 0x41d   :  { %635 = vsyncpa [#allocation3], 1 }
 0x41e   :  { %636 = vsyncpa [#allocation5], 1 }

</bundles_post_ra>
